<compile_context>
chip_gen: v7x
topology: tpu7x:2x2x1
jax: 0.10.0
libtpu: 0.0.40
codegen_flags: <defaults>
</compile_context>

<pallas_src>
import functools

import jax
import jax.numpy as jnp
from jax.experimental import pallas as pl
from jax.experimental.pallas import tpu as pltpu

LANE = 128
SUBLANE = 8


def m3gate_kernel(x_ref, w0_ref, b0_ref, w1_ref, b1_ref, w2_ref, b2_ref, out_ref):
    # Three dependent MXU matmuls, all operands already in VMEM.
    # Matmul inputs: bf16 (native on v6e/v7x MXU, halves operand bytes on v5e).
    # Accumulate in f32; keep bias-add/ReLU in f32 (v5e has no bf16 VPU/EUP).
    x = x_ref[...].astype(jnp.bfloat16)
    h0 = jnp.dot(x, w0_ref[...], preferred_element_type=jnp.float32) + b0_ref[...]
    h0 = jnp.maximum(h0, 0.0).astype(jnp.bfloat16)
    h1 = jnp.dot(h0, w1_ref[...], preferred_element_type=jnp.float32) + b1_ref[...]
    h1 = jnp.maximum(h1, 0.0).astype(jnp.bfloat16)
    out = jnp.dot(h1, w2_ref[...], preferred_element_type=jnp.float32) + b2_ref[...]
    out_ref[...] = out.astype(out_ref.dtype)


@functools.partial(jax.jit, static_argnames=("block_batch",))
def m3gate_forward(x, w0, b0, w1, b1, w2, b2, *, block_batch=512):
    """x:(B, state_dim) f32; weights stored (in, out); biases (1, out). Returns (B, im_dim) f32."""
    batch, state_dim = x.shape
    h1_dim = w0.shape[1]
    h2_dim = w1.shape[1]
    im_dim = w2.shape[1]

    # --- Lane-dense output: pad the tiny im_dim up to a multiple of 128 lanes. ---
    n_out = max(LANE, ((im_dim + LANE - 1) // LANE) * LANE)
    w2p = jnp.zeros((h2_dim, n_out), w2.dtype).at[:, :im_dim].set(w2)
    b2p = jnp.zeros((1, n_out), b2.dtype).at[:, :im_dim].set(b2)

    # Weights cast to bf16 once (they stay VMEM-resident across grid steps).
    w0b = w0.astype(jnp.bfloat16)
    w1b = w1.astype(jnp.bfloat16)
    w2b = w2p.astype(jnp.bfloat16)

    # --- Batch tiling: TB multiple of 8 (sublane), batch padded to multiple of TB. ---
    tb = ((batch + SUBLANE - 1) // SUBLANE) * SUBLANE
    tb = min(block_batch, tb)
    tb = ((tb + SUBLANE - 1) // SUBLANE) * SUBLANE
    padded_b = ((batch + tb - 1) // tb) * tb
    if padded_b != batch:
        x = jnp.pad(x, ((0, padded_b - batch), (0, 0)))
    grid = (padded_b // tb,)

    flops = 2 * padded_b * (state_dim * h1_dim + h1_dim * h2_dim + h2_dim * n_out)
    bytes_accessed = (
        padded_b * state_dim * 4            # x (f32 in HBM, cast in-kernel)
        + padded_b * n_out * 4              # padded output
        + (w0b.size + w1b.size + w2b.size) * 2
        + (b0.size + b1.size + b2p.size) * 4
    )

    def resident(a):
        # Same block every grid step -> DMA'd from HBM once, stays in VMEM.
        return pl.BlockSpec(a.shape, lambda i: tuple(0 for _ in a.shape))

    out = pl.pallas_call(
        m3gate_kernel,
        out_shape=jax.ShapeDtypeStruct((padded_b, n_out), jnp.float32),
        grid=grid,
        in_specs=[
            pl.BlockSpec((tb, state_dim), lambda i: (i, 0)),   # x: streamed per batch tile
            resident(w0b), resident(b0),
            resident(w1b), resident(b1),
            resident(w2b), resident(b2p),
        ],
        out_specs=pl.BlockSpec((tb, n_out), lambda i: (i, 0)),
        compiler_params=pltpu.CompilerParams(
            dimension_semantics=("parallel",),        # shard batch tiles across TCs (v7x)
            vmem_limit_bytes=32 * 1024 * 1024,        # safe on v5e/v6e/v7x scoped VMEM
        ),
        cost_estimate=pl.CostEstimate(
            flops=flops, transcendentals=0, bytes_accessed=bytes_accessed),
    )(x, w0b, b0, w1b, b1, w2b, b2p)

    return out[:batch, :im_dim]


def xavier_uniform(key, fan_in, fan_out):
    bound = (6.0 / (fan_in + fan_out)) ** 0.5
    return jax.random.uniform(key, (fan_in, fan_out), jnp.float32, -bound, bound)


def linear_bias(key, fan_in, fan_out):
    # PyTorch Linear default bias init: U(-1/sqrt(fan_in), 1/sqrt(fan_in)); kept as (1, out).
    bound = 1.0 / (fan_in ** 0.5)
    return jax.random.uniform(key, (1, fan_out), jnp.float32, -bound, bound)


def _ref_forward(x, w0, b0, w1, b1, w2, b2):
    r = jnp.maximum(x @ w0 + b0, 0.0)
    r = jnp.maximum(r @ w1 + b1, 0.0)
    return r @ w2 + b2


if __name__ == "__main__":
    # Shapes consistent with the module: state_dim=8, h1=32, h2=32, im_dim=4.
    state_dim, h1, h2, im_dim, batch = 8, 32, 32, 4, 2

    key = jax.random.PRNGKey(0)
    ks = jax.random.split(key, 8)

    x = jax.random.normal(ks[0], (batch, state_dim), jnp.float32)

    w0 = xavier_uniform(ks[1], state_dim, h1)
    b0 = linear_bias(ks[2], state_dim, h1)
    w1 = xavier_uniform(ks[3], h1, h2)
    b1 = linear_bias(ks[4], h1, h2)
    w2 = jax.random.uniform(ks[5], (h2, im_dim), jnp.float32, -0.3, 0.3)  # _output.weight init
    b2 = linear_bias(ks[6], h2, im_dim)

    # Small-batch run (single grid step).
    out = jax.block_until_ready(m3gate_forward(x, w0, b0, w1, b1, w2, b2))
    assert out.shape == (batch, im_dim)
    ref = _ref_forward(x, w0, b0, w1, b1, w2, b2)
    assert jnp.allclose(out, ref, atol=5e-2, rtol=5e-2), "mismatch vs f32 reference (small batch)"

    # Larger, non-tile-aligned batch exercises the grid tiling + padding path.
    xb = jax.random.normal(ks[7], (1000, state_dim), jnp.float32)
    out_b = jax.block_until_ready(m3gate_forward(xb, w0, b0, w1, b1, w2, b2))
    ref_b = _ref_forward(xb, w0, b0, w1, b1, w2, b2)
    assert out_b.shape == (1000, im_dim)
    assert jnp.allclose(out_b, ref_b, atol=5e-2, rtol=5e-2), "mismatch vs f32 reference (batched)"

    print("KERNEL_OK")
</pallas_src>

<mosaic_0001>
module attributes {stable_mosaic.version = 11 : i64} {
  func.func @m3gate_kernel(%arg0: i32, %arg1: memref<8x8xf32, #tpu.memory_space<vmem>>, %arg2: memref<8x32xbf16, #tpu.memory_space<vmem>>, %arg3: memref<1x32xf32, #tpu.memory_space<vmem>>, %arg4: memref<32x32xbf16, #tpu.memory_space<vmem>>, %arg5: memref<1x32xf32, #tpu.memory_space<vmem>>, %arg6: memref<32x128xbf16, #tpu.memory_space<vmem>>, %arg7: memref<1x128xf32, #tpu.memory_space<vmem>>, %arg8: memref<8x128xf32, #tpu.memory_space<vmem>>) attributes {dimension_semantics = [#tpu.dimension_semantics<parallel>], iteration_bounds = array<i64: 1>, scalar_prefetch = 0 : i64, scratch_operands = 0 : i64, tpu.core_type = #tpu.core_type<tc>, window_params = [{transform_indices = @transform_0, window_bounds = array<i64: 8, 8>}, {pipeline_mode = #tpu.pipeline_mode<synchronous>, transform_indices = @transform_1, window_bounds = array<i64: 8, 32>}, {pipeline_mode = #tpu.pipeline_mode<synchronous>, transform_indices = @transform_2, window_bounds = array<i64: 1, 32>}, {pipeline_mode = #tpu.pipeline_mode<synchronous>, transform_indices = @transform_3, window_bounds = array<i64: 32, 32>}, {pipeline_mode = #tpu.pipeline_mode<synchronous>, transform_indices = @transform_4, window_bounds = array<i64: 1, 32>}, {pipeline_mode = #tpu.pipeline_mode<synchronous>, transform_indices = @transform_5, window_bounds = array<i64: 32, 128>}, {pipeline_mode = #tpu.pipeline_mode<synchronous>, transform_indices = @transform_6, window_bounds = array<i64: 1, 128>}, {transform_indices = @transform_7, window_bounds = array<i64: 8, 128>}]} {
    %c0 = arith.constant 0 : index
    %c0_0 = arith.constant 0 : index
    %0 = vector.load %arg1[%c0, %c0_0] : memref<8x8xf32, #tpu.memory_space<vmem>>, vector<8x8xf32>
    %1 = arith.truncf %0 : vector<8x8xf32> to vector<8x8xbf16>
    %c0_1 = arith.constant 0 : index
    %c0_2 = arith.constant 0 : index
    %2 = vector.load %arg2[%c0_1, %c0_2] : memref<8x32xbf16, #tpu.memory_space<vmem>>, vector<8x32xbf16>
    %cst = arith.constant dense<0.000000e+00> : vector<8x32xf32>
    %3 = tpu.matmul %1, %2, %cst {dimension_numbers = #tpu.dot_dimension_numbers<[1], [0], [0], [1], [0, 0, 1, 1], [], []>} : vector<8x8xbf16>, vector<8x32xbf16>, vector<8x32xf32> -> vector<8x32xf32>
    %c0_3 = arith.constant 0 : index
    %c0_4 = arith.constant 0 : index
    %4 = vector.load %arg3[%c0_3, %c0_4] : memref<1x32xf32, #tpu.memory_space<vmem>>, vector<1x32xf32>
    %5 = vector.broadcast %4 : vector<1x32xf32> to vector<8x32xf32>
    %6 = arith.addf %3, %5 : vector<8x32xf32>
    %cst_5 = arith.constant 0.000000e+00 : f32
    %7 = vector.broadcast %cst_5 : f32 to vector<8x32xf32>
    %8 = arith.maximumf %6, %7 : vector<8x32xf32>
    %9 = arith.truncf %8 : vector<8x32xf32> to vector<8x32xbf16>
    %c0_6 = arith.constant 0 : index
    %c0_7 = arith.constant 0 : index
    %10 = vector.load %arg4[%c0_6, %c0_7] : memref<32x32xbf16, #tpu.memory_space<vmem>>, vector<32x32xbf16>
    %cst_8 = arith.constant dense<0.000000e+00> : vector<8x32xf32>
    %11 = tpu.matmul %9, %10, %cst_8 {dimension_numbers = #tpu.dot_dimension_numbers<[1], [0], [0], [1], [0, 0, 1, 1], [], []>} : vector<8x32xbf16>, vector<32x32xbf16>, vector<8x32xf32> -> vector<8x32xf32>
    %c0_9 = arith.constant 0 : index
    %c0_10 = arith.constant 0 : index
    %12 = vector.load %arg5[%c0_9, %c0_10] : memref<1x32xf32, #tpu.memory_space<vmem>>, vector<1x32xf32>
    %13 = vector.broadcast %12 : vector<1x32xf32> to vector<8x32xf32>
    %14 = arith.addf %11, %13 : vector<8x32xf32>
    %cst_11 = arith.constant 0.000000e+00 : f32
    %15 = vector.broadcast %cst_11 : f32 to vector<8x32xf32>
    %16 = arith.maximumf %14, %15 : vector<8x32xf32>
    %17 = arith.truncf %16 : vector<8x32xf32> to vector<8x32xbf16>
    %c0_12 = arith.constant 0 : index
    %c0_13 = arith.constant 0 : index
    %18 = vector.load %arg6[%c0_12, %c0_13] : memref<32x128xbf16, #tpu.memory_space<vmem>>, vector<32x128xbf16>
    %cst_14 = arith.constant dense<0.000000e+00> : vector<8x128xf32>
    %19 = tpu.matmul %17, %18, %cst_14 {dimension_numbers = #tpu.dot_dimension_numbers<[1], [0], [0], [1], [0, 0, 1, 1], [], []>} : vector<8x32xbf16>, vector<32x128xbf16>, vector<8x128xf32> -> vector<8x128xf32>
    %c0_15 = arith.constant 0 : index
    %c0_16 = arith.constant 0 : index
    %20 = vector.load %arg7[%c0_15, %c0_16] : memref<1x128xf32, #tpu.memory_space<vmem>>, vector<1x128xf32>
    %21 = vector.broadcast %20 : vector<1x128xf32> to vector<8x128xf32>
    %22 = arith.addf %19, %21 : vector<8x128xf32>
    %c0_17 = arith.constant 0 : index
    %c0_18 = arith.constant 0 : index
    %23 = vector.load %arg8[%c0_17, %c0_18] : memref<8x128xf32, #tpu.memory_space<vmem>>, vector<8x128xf32>
    tpu.vector_store %arg8[%c0_17, %c0_18], %22 {strides = array<i32>} : memref<8x128xf32, #tpu.memory_space<vmem>>, vector<8x128xf32>,
    return
  }
  func.func @transform_0(%arg0: i32) -> (i32, i32) {
    %c0_i32 = arith.constant 0 : i32
    %c0_i32_0 = arith.constant 0 : i32
    return %arg0, %c0_i32 : i32, i32
  }
  func.func @transform_1(%arg0: i32) -> (i32, i32) {
    %c0_i32 = arith.constant 0 : i32
    %c0_i32_0 = arith.constant 0 : i32
    %c0_i32_1 = arith.constant 0 : i32
    return %c0_i32, %c0_i32_0 : i32, i32
  }
  func.func @transform_2(%arg0: i32) -> (i32, i32) {
    %c0_i32 = arith.constant 0 : i32
    %c0_i32_0 = arith.constant 0 : i32
    %c0_i32_1 = arith.constant 0 : i32
    return %c0_i32, %c0_i32_0 : i32, i32
  }
  func.func @transform_3(%arg0: i32) -> (i32, i32) {
    %c0_i32 = arith.constant 0 : i32
    %c0_i32_0 = arith.constant 0 : i32
    %c0_i32_1 = arith.constant 0 : i32
    return %c0_i32, %c0_i32_0 : i32, i32
  }
  func.func @transform_4(%arg0: i32) -> (i32, i32) {
    %c0_i32 = arith.constant 0 : i32
    %c0_i32_0 = arith.constant 0 : i32
    %c0_i32_1 = arith.constant 0 : i32
    return %c0_i32, %c0_i32_0 : i32, i32
  }
  func.func @transform_5(%arg0: i32) -> (i32, i32) {
    %c0_i32 = arith.constant 0 : i32
    %c0_i32_0 = arith.constant 0 : i32
    %c0_i32_1 = arith.constant 0 : i32
    return %c0_i32, %c0_i32_0 : i32, i32
  }
  func.func @transform_6(%arg0: i32) -> (i32, i32) {
    %c0_i32 = arith.constant 0 : i32
    %c0_i32_0 = arith.constant 0 : i32
    %c0_i32_1 = arith.constant 0 : i32
    return %c0_i32, %c0_i32_0 : i32, i32
  }
  func.func @transform_7(%arg0: i32) -> (i32, i32) {
    %c0_i32 = arith.constant 0 : i32
    %c0_i32_0 = arith.constant 0 : i32
    return %arg0, %c0_i32 : i32, i32
  }
}

</mosaic_0001>

<bundles_post_ra>
// kernel: m3gate_forward.1
= control target key start
LH: loop header
LB: loop body
LE: loop exit
PB: predicated region body
PF: predicated region fallthrough
CT: control target
= control target key end

     0   :  { %vm41_vm0 = vcmask 1043456   ;;  %v273_v0 = vmov 0.0   ;;  %vm274_vm1 = vmmov 0   ;;  %vm37_vm2 = vcmask 64512   ;;  %s345_s1 = inlined_call_operand.vmem [shape: bf16[8,32], index: 1, kind: input, shape index: {}]   ;;  %s346_s0 = inlined_call_operand.vmem [shape: f32[8,8], index: 0, kind: input, shape index: {}]   ;;  %s347_s3 = inlined_call_operand.vmem [shape: bf16[32,32], index: 3, kind: input, shape index: {}]   ;;  %s348_s5 = inlined_call_operand.vmem [shape: bf16[32,128], index: 5, kind: input, shape index: {}]   ;;  %s349_s2 = inlined_call_operand.vmem [shape: f32[1,32], index: 2, kind: input, shape index: {}]   ;;  %s350_s4 = inlined_call_operand.vmem [shape: f32[1,32], index: 4, kind: input, shape index: {}]   ;;  %s351_s6 = inlined_call_operand.vmem [shape: f32[1,128], index: 6, kind: input, shape index: {}]   ;;  %s352_s7 = inlined_call_operand.vmem [shape: f32[8,128], index: 7, kind: output, shape index: {}]  }
   0x1   :  { %245 = vmatprep.subr.bf16.mxu0 %v273_v0  ;;  %v29_v1 = vld [vmem:[%s345_s1] sm:$0xf]  ;;  %247 = vmatprep.mubr.msk.bf16.mxu0 %vm274_vm1, %v273_v0  ;;  %v270_v6 = vld [vmem:[%s347_s3 + $0x8] sm:$0xff]   ;;  %vm110_vm3 = vcmask 261120  }
   0x2   :  { %v27_v2 = vld [vmem:[%s346_s0] sm:$0xff]  ;;  %v43_v3 = vsel %vm41_vm0, %v29_v1, 0  ;;  %251 = vmatprep.subr.bf16.mxu1 %v273_v0  ;;  %255 = vmatprep.mubr.msk.bf16.mxu1 %vm274_vm1, %v273_v0  ;;  %v272_v16 = vld [vmem:[%s348_s5 + $0x8] sm:$0xff]  }
   0x3   :  { %v28_v4 = vpack.c.bf16 %v27_v2, %v27_v2  ;;  %246 = vmatpush3.bf16.msra.mxu0 %v43_v3  ;;  %v269_v5 = vld [vmem:[%s347_s3] sm:$0xff]  }
   0x4   :  { %259 = vmatprep.subr.bf16.mxu0 %v273_v0  ;;  %252 = vmatpush3.bf16.msra.mxu1 %v269_v5  ;;  %v271_v7 = vld [vmem:[%s348_s5] sm:$0xff]  }
   0x5   :  { %253 = vmatprep.subr.bf16.mxu1 %v273_v0  ;;  %v227_v8 = vld [vmem:[%s349_s2] ss:$0 sm:$0xff] }
   0x6   :  { %248 = vmatmul.mubr.msk.bf16.vlgmr.msra.gmra.mrb[0].mxu0 %vm37_vm2, %v28_v4  ;;  %v229_v17 = vld [vmem:[%s350_s4] ss:$0 sm:$0xff] }
   0x7   :  { %263 = vmatprep.mubr.msk.bf16.mxu0 %vm274_vm1, %v273_v0  ;;  %260 = vmatpush3.bf16.msra.mxu0 %v271_v7  ;;  %v233_v25 = vld [vmem:[%s351_s6] ss:$0 sm:$0xff] }
   0x8   :  { %254 = vmatpush3.bf16.msra.mxu1 %v270_v6  ;;  %261 = vmatprep.subr.bf16.mxu0 %v273_v0 }
   0xb   :  { %262 = vmatpush3.bf16.msra.mxu0 %v272_v16 }
  0xd9   :  { %v79_v9 = vpop.f32.mrb[0].mxu0 }
  0xda   :  { %v80_v10 = vadd.f32 %v227_v8, %v79_v9  ;;  %v249_v11 = vpop.f32.mrb[1].mxu0 }
  0xdb   :  { %v82_v12 = vpop.f32.mrb[2].mxu0 }
  0xdc   :  { %v85_v13 = vmax.f32 %v80_v10, 0.0  ;;  %v250_v14 = vpop.f32.mrb[3].mxu0 }
  0xde   :  { %v86_v15 = vpack.c.bf16 %v85_v13, %v85_v13 }
  0xe0   :  { %256 = vmatmul.mubr.msk.bf16.vlgmr.msra.gmra.mrb[0].mxu1 %vm110_vm3, %v86_v15 }
 0x1b3   :  { %v148_v18 = vpop.f32.mrb[0].mxu1 }
 0x1b4   :  { %v149_v19 = vadd.f32 %v229_v17, %v148_v18  ;;  %v257_v20 = vpop.f32.mrb[1].mxu1 }
 0x1b5   :  { %v151_v21 = vpop.f32.mrb[2].mxu1 }
 0x1b6   :  { %v154_v22 = vmax.f32 %v149_v19, 0.0  ;;  %v258_v23 = vpop.f32.mrb[3].mxu1 }
 0x1b8   :  { %v155_v24 = vpack.c.bf16 %v154_v22, %v154_v22 }
 0x1ba   :  { %264 = vmatmul.mubr.msk.bf16.vlgmr.msra.gmra.mrb[4].mxu0 %vm110_vm3, %v155_v24 }
 0x28d   :  { %v216_v26 = vpop.f32.mrb[4].mxu0 }
 0x28e   :  { %v217_v27 = vadd.f32 %v233_v25, %v216_v26  ;;  %v265_v28 = vpop.f32.mrb[5].mxu0 }
 0x28f   :  { %v219_v29 = vpop.f32.mrb[6].mxu0 }
 0x290   :  { %222 = vst [vmem:[%s352_s7] sm:$0xff] %v217_v27  ;;  %v266_v30 = vpop.f32.mrb[7].mxu0 }

</bundles_post_ra>
